<compile_context>
chip_gen: v7x
topology: tpu7x:2x2x1
jax: 0.10.0
libtpu: 0.0.40
codegen_flags: <defaults>
</compile_context>

<pallas_src>
import jax
import jax.numpy as jnp
from jax import lax
from jax.experimental import pallas as pl
from jax.experimental.pallas import tpu as pltpu

FROZEN_DTYPE = jnp.bfloat16   # args.frozen_dtype (on-disk checkpoint dtype)
COMPUTE_DTYPE = jnp.float32   # args.compute_dtype

_LANE = 128
_SUBLANE_BF16 = 16


def _round_up(x, q):
    return ((x + q - 1) // q) * q


def _pick_tile(dim, target, quantum=_LANE):
    """Largest multiple of `quantum` <= target that divides `dim`.
    `dim` must already be a multiple of `quantum` (wrapper pads it)."""
    t = max((min(target, dim) // quantum) * quantum, quantum)
    while dim % t != 0:
        t -= quantum
    return t


def _vmem_plan_bytes(tm, tn, tk):
    """Rough double-buffered VMEM footprint of one tile plan."""
    x_b = 2 * tm * tk * 2                    # bf16 x tile, 2 buffers
    w_b = 2 * tn * tk * 2                    # bf16 w tile, 2 buffers
    b_b = 2 * _round_up(tn, _LANE) * 2       # bf16 bias tile
    o_b = 2 * tm * tn * 4                    # f32 resident output tile
    return x_b + w_b + b_b + o_b


# ----------------------------- kernels --------------------------------------

def _linear_kernel_kloop(x_ref, w_ref, b_ref, o_ref):
    """(i, j, k) grid step of y = x @ w.T + b; accumulates directly into the
    resident f32 output tile (no scratch accumulator)."""
    k = pl.program_id(2)

    @pl.when(k == 0)
    def _init():
        # Initialize with the broadcast bias instead of zeros: removes the
        # epilogue copy and the separate accumulator entirely.
        o_ref[...] = jnp.broadcast_to(b_ref[...].astype(jnp.float32),
                                      o_ref.shape)

    # bf16 x bf16 MXU contraction, f32 accumulation.  The frozen torch
    # (out, in) layout is contracted along the last dims -> no transpose.
    o_ref[...] += lax.dot_general(
        x_ref[...], w_ref[...],
        dimension_numbers=(((1,), (1,)), ((), ())),
        preferred_element_type=jnp.float32)


def _linear_kernel_nok(x_ref, w_ref, b_ref, o_ref):
    """Fast path: full K resident -> no reduction axis, no pl.when, no RMW."""
    o_ref[...] = lax.dot_general(
        x_ref[...], w_ref[...],
        dimension_numbers=(((1,), (1,)), ((), ())),
        preferred_element_type=jnp.float32) + b_ref[...].astype(jnp.float32)


# ----------------------------- wrapper --------------------------------------

def blackbox_disk_forward(x, w_frozen, b_frozen):
    """BlackboxDisk.forward for an inner nn.Linear(h_in -> h_out).

    x        : (batch, seq, h_in)   in compute_dtype
    w_frozen : (h_out, h_in)        in frozen_dtype (torch Linear layout)
    b_frozen : (h_out,)             in frozen_dtype
    returns  : (batch, seq, h_out)  in compute_dtype
    """
    batch, seq, h_in = x.shape
    h_out = w_frozen.shape[0]
    m = batch * seq

    # Pad hidden dims to lane multiples so every tile stays (16/8, 128)
    # aligned and _pick_tile can never fall back to a huge unaligned tile.
    h_in_p = _round_up(h_in, _LANE)
    h_out_p = _round_up(h_out, _LANE)

    x2d = x.reshape(m, h_in).astype(FROZEN_DTYPE)     # cast once, not per tile
    w = w_frozen
    b = b_frozen
    if h_in_p != h_in:
        x2d = jnp.pad(x2d, ((0, 0), (0, h_in_p - h_in)))
        w = jnp.pad(w, ((0, 0), (0, h_in_p - h_in)))
    if h_out_p != h_out:
        w = jnp.pad(w, ((0, h_out_p - h_out), (0, 0)))
        b = jnp.pad(b, ((0, h_out_p - h_out),))
    b2d = b.reshape(1, h_out_p)

    # ---- tile plan --------------------------------------------------------
    # M tile: bf16-sublane aligned (multiple of 16); single block for small M,
    # 512-row tiles (>=2 blocks -> both v7x TensorCores busy) for large M.
    m16 = _round_up(m, _SUBLANE_BF16)
    if m16 <= 512:
        tm, m_pad = m16, m16
    else:
        tm = 512
        m_pad = _round_up(m, tm)
    if m_pad != m:
        # At most tm-1 pad rows (zero rows for the demo; <0.1% of x at scale).
        x2d = jnp.pad(x2d, ((0, m_pad - m), (0, 0)))

    # Weight-resident fast path: DMA the whole bf16 weight and bias exactly
    # once (constant block index) and drop the K reduction loop.  Capped so
    # the full double-buffered plan fits inside v7x's 64 MiB per-TC VMEM.
    w_resident_cap = 8 << 20           # bf16 weight bytes
    plan_cap = 28 << 20                # total double-buffered plan bytes
    if (h_out_p * h_in_p * 2 <= w_resident_cap
            and _vmem_plan_bytes(tm, h_out_p, h_in_p) <= plan_cap):
        tn, tk = h_out_p, h_in_p
    else:
        tn = _pick_tile(h_out_p, 1024)
        tk = _pick_tile(h_in_p, 1024)
        while _vmem_plan_bytes(tm, tn, tk) > plan_cap and tk > _LANE:
            tk = _pick_tile(h_in_p, tk // 2)
        while _vmem_plan_bytes(tm, tn, tk) > plan_cap and tn > _LANE:
            tn = _pick_tile(h_out_p, tn // 2)

    grid_m, grid_n, grid_k = m_pad // tm, h_out_p // tn, h_in_p // tk
    plan_bytes = _vmem_plan_bytes(tm, tn, tk)
    vmem_limit = int(min(max(32 << 20, plan_bytes * 3 // 2 + (2 << 20)),
                         56 << 20))

    cost = pl.CostEstimate(
        flops=2 * m_pad * h_out_p * h_in_p,
        transcendentals=0,
        bytes_accessed=(grid_n * m_pad * h_in_p * 2      # x re-streamed per N tile
                        + grid_m * h_out_p * h_in_p * 2  # w re-streamed per M tile
                        + h_out_p * 2                    # bias
                        + m_pad * h_out_p * 4))          # output

    if grid_k == 1:
        grid = (grid_m, grid_n)
        kernel = _linear_kernel_nok
        in_specs = [
            pl.BlockSpec((tm, tk), lambda i, j: (i, 0)),   # x tile
            pl.BlockSpec((tn, tk), lambda i, j: (j, 0)),   # w tile (out, in)
            pl.BlockSpec((1, tn), lambda i, j: (0, j)),    # bias tile
        ]
        out_spec = pl.BlockSpec((tm, tn), lambda i, j: (i, j))
        dim_sem = ("parallel", "parallel")
    else:
        grid = (grid_m, grid_n, grid_k)
        kernel = _linear_kernel_kloop
        in_specs = [
            pl.BlockSpec((tm, tk), lambda i, j, k: (i, k)),
            pl.BlockSpec((tn, tk), lambda i, j, k: (j, k)),
            pl.BlockSpec((1, tn), lambda i, j, k: (0, j)),
        ]
        out_spec = pl.BlockSpec((tm, tn), lambda i, j, k: (i, j))
        dim_sem = ("parallel", "parallel", "arbitrary")

    out2d = pl.pallas_call(
        kernel,
        out_shape=jax.ShapeDtypeStruct((m_pad, h_out_p), COMPUTE_DTYPE),
        grid_spec=pltpu.PrefetchScalarGridSpec(
            num_scalar_prefetch=0,
            grid=grid,
            in_specs=in_specs,
            out_specs=out_spec,
        ),
        compiler_params=pltpu.CompilerParams(
            dimension_semantics=dim_sem,
            vmem_limit_bytes=vmem_limit),
        cost_estimate=cost,
    )(x2d, w, b2d)

    if m_pad != m:
        out2d = out2d[:m]
    if h_out_p != h_out:
        out2d = out2d[:, :h_out]
    return out2d.reshape(batch, seq, h_out)


if __name__ == "__main__":
    key = jax.random.PRNGKey(0)
    k_x, k_w, k_b = jax.random.split(key, 3)

    batch, seq, hidden = 2, 8, 128

    x = jax.random.normal(k_x, (batch, seq, hidden), dtype=COMPUTE_DTYPE)

    # "Frozen" on-disk parameters of the inner Linear(H, H), stored in
    # frozen_dtype exactly as the checkpoint would be.
    w_frozen = (jax.random.normal(k_w, (hidden, hidden), dtype=jnp.float32)
                * (1.0 / jnp.sqrt(hidden))).astype(FROZEN_DTYPE)
    b_frozen = (jax.random.normal(k_b, (hidden,), dtype=jnp.float32)
                * 0.01).astype(FROZEN_DTYPE)

    out = jax.block_until_ready(blackbox_disk_forward(x, w_frozen, b_frozen))

    # Pure-JAX reference matching the kernel numerics (bf16 operands, f32 acc,
    # f32 bias add) of load() -> cast -> linear.
    x_bf16 = x.reshape(-1, hidden).astype(FROZEN_DTYPE)
    ref2d = lax.dot_general(
        x_bf16, w_frozen,
        dimension_numbers=(((1,), (1,)), ((), ())),
        preferred_element_type=jnp.float32) + b_frozen.astype(jnp.float32)
    ref = ref2d.reshape(batch, seq, hidden)
    assert jnp.allclose(out, ref, atol=2e-3, rtol=2e-3), (
        float(jnp.max(jnp.abs(out - ref))))

    print("KERNEL_OK")
</pallas_src>

<mosaic_0001>
module attributes {stable_mosaic.version = 11 : i64} {
  func.func @_linear_kernel_nok(%arg0: i32, %arg1: i32, %arg2: memref<16x128xbf16, #tpu.memory_space<vmem>>, %arg3: memref<128x128xbf16, #tpu.memory_space<vmem>>, %arg4: memref<1x128xbf16, #tpu.memory_space<vmem>>, %arg5: memref<16x128xf32, #tpu.memory_space<vmem>>) attributes {dimension_semantics = [#tpu.dimension_semantics<parallel>, #tpu.dimension_semantics<parallel>], iteration_bounds = array<i64: 1, 1>, scalar_prefetch = 0 : i64, scratch_operands = 0 : i64, tpu.core_type = #tpu.core_type<tc>, window_params = [{transform_indices = @transform_0, window_bounds = array<i64: 16, 128>}, {transform_indices = @transform_1, window_bounds = array<i64: 128, 128>}, {transform_indices = @transform_2, window_bounds = array<i64: 1, 128>}, {transform_indices = @transform_3, window_bounds = array<i64: 16, 128>}]} {
    %c0 = arith.constant 0 : index
    %c0_0 = arith.constant 0 : index
    %0 = vector.load %arg2[%c0, %c0_0] : memref<16x128xbf16, #tpu.memory_space<vmem>>, vector<16x128xbf16>
    %c0_1 = arith.constant 0 : index
    %c0_2 = arith.constant 0 : index
    %1 = vector.load %arg3[%c0_1, %c0_2] : memref<128x128xbf16, #tpu.memory_space<vmem>>, vector<128x128xbf16>
    %cst = arith.constant dense<0.000000e+00> : vector<16x128xf32>
    %2 = tpu.matmul %0, %1, %cst {dimension_numbers = #tpu.dot_dimension_numbers<[1], [1], [0], [0], [0, 0, 1, 0], [], []>} : vector<16x128xbf16>, vector<128x128xbf16>, vector<16x128xf32> -> vector<16x128xf32>
    %c0_3 = arith.constant 0 : index
    %c0_4 = arith.constant 0 : index
    %3 = vector.load %arg4[%c0_3, %c0_4] : memref<1x128xbf16, #tpu.memory_space<vmem>>, vector<1x128xbf16>
    %4 = arith.extf %3 : vector<1x128xbf16> to vector<1x128xf32>
    %5 = vector.broadcast %4 : vector<1x128xf32> to vector<16x128xf32>
    %6 = arith.addf %2, %5 : vector<16x128xf32>
    %c0_5 = arith.constant 0 : index
    %c0_6 = arith.constant 0 : index
    %7 = vector.load %arg5[%c0_5, %c0_6] : memref<16x128xf32, #tpu.memory_space<vmem>>, vector<16x128xf32>
    tpu.vector_store %arg5[%c0_5, %c0_6], %6 {strides = array<i32>} : memref<16x128xf32, #tpu.memory_space<vmem>>, vector<16x128xf32>,
    return
  }
  func.func @transform_0(%arg0: i32, %arg1: i32) -> (i32, i32) {
    %c0_i32 = arith.constant 0 : i32
    %c0_i32_0 = arith.constant 0 : i32
    return %arg0, %c0_i32 : i32, i32
  }
  func.func @transform_1(%arg0: i32, %arg1: i32) -> (i32, i32) {
    %c0_i32 = arith.constant 0 : i32
    %c0_i32_0 = arith.constant 0 : i32
    return %arg1, %c0_i32 : i32, i32
  }
  func.func @transform_2(%arg0: i32, %arg1: i32) -> (i32, i32) {
    %c0_i32 = arith.constant 0 : i32
    %c0_i32_0 = arith.constant 0 : i32
    return %c0_i32, %arg1 : i32, i32
  }
  func.func @transform_3(%arg0: i32, %arg1: i32) -> (i32, i32) {
    %c0_i32 = arith.constant 0 : i32
    return %arg0, %arg1 : i32, i32
  }
}

</mosaic_0001>

<bundles_post_ra>
// kernel: tpu_custom_call.1
= control target key start
LH: loop header
LB: loop body
LE: loop exit
PB: predicated region body
PF: predicated region fallthrough
CT: control target
= control target key end

     0   :  { %8 = vsyncpa [#allocation3], 0  ;;  %s379_s0 = inlined_call_operand.hbm [shape: bf16[16,128], index: 0, kind: input, shape index: {}]   ;;  %s380_s1 = inlined_call_operand.hbm [shape: bf16[128,128], index: 1, kind: input, shape index: {}]   ;;  %s381_s2 = inlined_call_operand.vmem [shape: bf16[1,128], index: 2, kind: input, shape index: {}]   ;;  %s382_s3 = inlined_call_operand.hbm [shape: f32[16,128], index: 3, kind: output, shape index: {}]  }
   0x1   :  { %9 = vsyncpa [#allocation6], 0 }
   0x2   :  { %10 = vsyncpa [#allocation4], 0  ;;  %s311_s12 = smov [#allocation2]   ;;  %s239_s16 = scalar_lea.hbm %s379_s0, 128 }
   0x3   :  { %s16_s13 = sshll.u32 %s311_s12, 4  ;;  %p240_p0 = scmp.ne.s32.totalorder %s379_s0, %s239_s16  ;;  %s17_s13 = int_to_ptr.vmem [resolvable:$true] %s16_s13 }
   0x4   :  { %p243_p1 = scmp.lt.u32.totalorder %s239_s16, %s379_s0 }
   0x6   :  { %p245_p2 = pnand %p243_p1, %p240_p0 }
   0x8   :  { %248 = shalt.err (!%p245_p2)
}
   0x9   :  { %s249_s21 = scalar_lea.vmem %s17_s13, 128  ;;  %p254_p4 = scmp.lt.s32.totalorder %s17_s13, %s17_s13 }
   0xa   :  { %p250_p3 = scmp.ne.s32.totalorder %s17_s13, %s249_s21  ;;  %p255_p5 = scmp.lt.s32.totalorder %s249_s21, %s249_s21 }
   0xc   :  { %p256_p6 = por %p255_p5, %p254_p4 }
   0xe   :  { %p257_p7 = pnand %p256_p6, %p250_p3 }
  0x10   :  { %260 = shalt.err (!%p257_p7)
}
  0x11   :  { %s312_s22 = smov 64   ;;  %s313_s23 = smov 4  }
  0x12   :  { %22 = dma.hbm_to_vmem [thread:$0]  %s379_s0, 128, %s17_s13, [#allocation3], %s312_s22, %s312_s22, %s313_s23  }
  0x13   :  { %s314_s26 = smov [#allocation5]   ;;  %s261_s30 = scalar_lea.hbm %s380_s1, 1024 }
  0x14   :  { %s28_s27 = sshll.u32 %s314_s26, 4  ;;  %p262_p8 = scmp.ne.s32.totalorder %s380_s1, %s261_s30  ;;  %s29_s27 = int_to_ptr.vmem [resolvable:$true] %s28_s27 }
  0x15   :  { %p265_p9 = scmp.lt.u32.totalorder %s261_s30, %s380_s1 }
  0x17   :  { %p267_p10 = pnand %p265_p9, %p262_p8 }
  0x19   :  { %270 = shalt.err (!%p267_p10)
}
  0x1a   :  { %s271_s8 = scalar_lea.vmem %s29_s27, 1024  ;;  %p276_p12 = scmp.lt.s32.totalorder %s29_s27, %s29_s27 }
  0x1b   :  { %p272_p11 = scmp.ne.s32.totalorder %s29_s27, %s271_s8  ;;  %p277_p13 = scmp.lt.s32.totalorder %s271_s8, %s271_s8 }
  0x1d   :  { %p278_p0 = por %p277_p13, %p276_p12 }
  0x1f   :  { %p279_p1 = pnand %p278_p0, %p272_p11 }
  0x21   :  { %282 = shalt.err (!%p279_p1)
}
  0x22   :  { %34 = dma.hbm_to_vmem [thread:$0]  %s380_s1, 1024, %s29_s27, [#allocation6], %s312_s22, %s312_s22, %s313_s23  }
  0x23   :  { %305 = dma.done.wait [#allocation3], 128  }
  0x24   :  { %306 = vsyncadd [#allocation3], 4294967168 }
  0x25   :  { %307 = dma.done.wait [#allocation6], 1024  }
  0x26   :  { %308 = vsyncadd [#allocation6], 4294966272  ;;  %v315_v0 = vmov 0.0   ;;  %vm316_vm0 = vmmov 0   ;;  %v230_v1 = vld [vmem:[#allocation5] sm:$0xff]   ;;  %v231_v2 = vld [vmem:[#allocation5 + $0x8] sm:$0xff]   ;;  %v64_v10 = vlaneseq }
  0x27   :  { %201 = vmatprep.subr.bf16.mxu0 %v315_v0  ;;  %217 = vmatprep.mubr.msk.bf16.mxu0 %vm316_vm0, %v315_v0  ;;  %v232_v3 = vld [vmem:[#allocation5 + $0x10] sm:$0xff]   ;;  %v233_v4 = vld [vmem:[#allocation5 + $0x18] sm:$0xff]   ;;  %v234_v5 = vld [vmem:[#allocation5 + $0x20] sm:$0xff]   ;;  %s317_s11 = smov [#allocation7]  }
  0x28   :  { %202 = vmatpush3.bf16.xpose.msra.mxu0 %v230_v1  ;;  %v235_v6 = vld [vmem:[#allocation5 + $0x28] sm:$0xff]   ;;  %v236_v7 = vld [vmem:[#allocation5 + $0x30] sm:$0xff]   ;;  %v237_v8 = vld [vmem:[#allocation5 + $0x38] sm:$0xff]   ;;  %v65_v11 = vshrl.u32 %v64_v10, 7  ;;  %s170_s12 = sshll.u32 %s317_s11, 4  ;;  %s171_s12 = int_to_ptr.vmem [resolvable:$true] %s170_s12 }
  0x29   :  { %203 = vmatprep.subr.bf16.mxu0 %v315_v0  ;;  %v238_v9 = vld [vmem:[#allocation2] sm:$0xff]   ;;  %s283_s13 = scalar_lea.vmem %s171_s12, 256  ;;  %p288_p3 = scmp.lt.s32.totalorder %s171_s12, %s171_s12 }
  0x2a   :  { %v62_v12 = vld [vmem:[%s381_s2] sm:$0x1]  ;;  %v66_v14 = vsub.s32 0, %v65_v11  ;;  %p284_p2 = scmp.ne.s32.totalorder %s171_s12, %s283_s13  ;;  %p289_p4 = scmp.lt.s32.totalorder %s283_s13, %s283_s13 }
  0x2b   :  { %v63_v13 = vunpack.c.l.bf16 %v62_v12 }
  0x2c   :  { %p290_p5 = por %p289_p4, %p288_p3 }
  0x2d   :  { %v67_v15 = vrot.slane %v63_v13, %v66_v14 }
  0x2e   :  { %p291_p6 = pnand %p290_p5, %p284_p2 }
  0x30   :  { %204 = vmatpush3.bf16.xpose.msra.mxu0 %v231_v2 }
  0x31   :  { %205 = vmatprep.subr.bf16.mxu0 %v315_v0 }
  0x38   :  { %206 = vmatpush3.bf16.xpose.msra.mxu0 %v232_v3 }
  0x39   :  { %207 = vmatprep.subr.bf16.mxu0 %v315_v0 }
  0x40   :  { %208 = vmatpush3.bf16.xpose.msra.mxu0 %v233_v4 }
  0x41   :  { %209 = vmatprep.subr.bf16.mxu0 %v315_v0 }
  0x48   :  { %210 = vmatpush3.bf16.xpose.msra.mxu0 %v234_v5 }
  0x49   :  { %211 = vmatprep.subr.bf16.mxu0 %v315_v0 }
  0x50   :  { %212 = vmatpush3.bf16.xpose.msra.mxu0 %v235_v6 }
  0x51   :  { %213 = vmatprep.subr.bf16.mxu0 %v315_v0 }
  0x58   :  { %214 = vmatpush3.bf16.xpose.msra.mxu0 %v236_v7 }
  0x59   :  { %215 = vmatprep.subr.bf16.mxu0 %v315_v0 }
  0x60   :  { %216 = vmatpush3.bf16.xpose.msra.mxu0 %v237_v8 }
  0x67   :  { %218 = vmatmul.mubr.bf16.vlgmr.msra.gmra.mrb[0].mxu0 %v238_v9 }
 0x13a   :  { %v156_v16 = vpop.f32.mrb[0].mxu0 }
 0x13b   :  { %v157_v17 = vadd.f32 %v156_v16, %v67_v15  ;;  %v219_v18 = vpop.f32.mrb[1].mxu0 }
 0x13c   :  { %v159_v19 = vpop.f32.mrb[2].mxu0 }
 0x13d   :  { %163 = vst [vmem:[#allocation7] sm:$0xff] %v157_v17  ;;  %v160_v20 = vadd.f32 %v159_v19, %v67_v15  ;;  %v220_v21 = vpop.f32.mrb[3].mxu0 }
 0x13f   :  { %164 = vst [vmem:[#allocation7 + $0x8] sm:$0xff] %v160_v20 }
 0x140   :  { %294 = shalt.err (!%p291_p6)
}
 0x141   :  { %s295_s15 = scalar_lea.hbm %s382_s3, 256 }
 0x142   :  { %p296_p7 = scmp.ne.s32.totalorder %s382_s3, %s295_s15  ;;  %p299_p8 = scmp.lt.u32.totalorder %s295_s15, %s382_s3 }
 0x144   :  { %p301_p9 = pnand %p299_p8, %p296_p7 }
 0x146   :  { %304 = shalt.err (!%p301_p9)
}
 0x147   :  { %s318_s20 = smov 128   ;;  %s319_s21 = smov 8  }
 0x148   :  { %176 = dma.vmem_to_hbm [thread:$0]  %s171_s12, 256, %s382_s3, [#allocation4], %s318_s20, %s318_s20, %s319_s21  }
 0x149   :  { %309 = dma.done.wait [#allocation4], 256  }
 0x14a   :  { %310 = vsyncadd [#allocation4], 4294967040 }
 0x14b   :  { %180 = vsyncpa [#allocation3], 1 }
 0x14c   :  { %181 = vsyncpa [#allocation6], 1 }
 0x14d   :  { %182 = vsyncpa [#allocation4], 1 }

</bundles_post_ra>
